<compile_context>
chip_gen: v7x
topology: tpu7x:2x2x1
jax: 0.10.0
libtpu: 0.0.40
codegen_flags: <defaults>
</compile_context>

<pallas_src>
import jax
import jax.numpy as jnp
from jax import lax
from jax.experimental import pallas as pl
from jax.experimental.pallas import tpu as pltpu


def _make_kernel(B, D, block_b, block_n, lambda_coeff, inv_batch, mxu_dtype,
                 need_mask):
    # Plain Python floats -> compile-time literals (no captured tracers).
    lam = float(lambda_coeff)
    inv_b = float(inv_batch)                  # 1 / batch_size (module divisor)
    inv_B = 1.0 / float(B)                    # 1 / actual batch (means)
    inv_Bm1 = 1.0 / float(max(B - 1, 1))      # torch.std default: ddof=1

    def kernel(z1_ref, z2_ref, o_ref, acc_ref, s1_ref, q1_ref, s2_ref, q2_ref):
        j = pl.program_id(0)                  # output column tile ("parallel")
        k = pl.program_id(1)                  # batch chunk ("arbitrary")
        nk = pl.num_programs(1)

        @pl.when(k == 0)
        def _():
            acc_ref[...] = jnp.zeros_like(acc_ref)
            s1_ref[...] = jnp.zeros_like(s1_ref)
            q1_ref[...] = jnp.zeros_like(q1_ref)
            s2_ref[...] = jnp.zeros_like(s2_ref)
            q2_ref[...] = jnp.zeros_like(q2_ref)

        def accumulate(z1c, z2c):
            # Per-feature first/second moments (VPU sublane reductions).
            s1_ref[...] += jnp.sum(z1c, axis=0, keepdims=True)
            q1_ref[...] += jnp.sum(z1c * z1c, axis=0, keepdims=True)
            s2_ref[...] += jnp.sum(z2c, axis=0, keepdims=True)
            q2_ref[...] += jnp.sum(z2c * z2c, axis=0, keepdims=True)
            # Raw (uncentered) Gram partial on the MXU, f32 accumulation.
            acc_ref[...] += lax.dot_general(
                z1c.astype(mxu_dtype), z2c.astype(mxu_dtype),
                dimension_numbers=(((0,), (0,)), ((), ())),
                preferred_element_type=jnp.float32)

        if need_mask:
            # Tail-row masking only ever applies to the final batch chunk, so
            # keep the iota/select path out of the steady-state loop.
            @pl.when(k != nk - 1)
            def _():
                accumulate(z1_ref[...], z2_ref[...])

            @pl.when(k == nk - 1)
            def _():
                r1 = k * block_b + lax.broadcasted_iota(
                    jnp.int32, (block_b, D), 0)
                r2 = k * block_b + lax.broadcasted_iota(
                    jnp.int32, (block_b, block_n), 0)
                accumulate(jnp.where(r1 < B, z1_ref[...], 0.0),
                           jnp.where(r2 < B, z2_ref[...], 0.0))
        else:
            accumulate(z1_ref[...], z2_ref[...])

        @pl.when(k == nk - 1)
        def _():
            sum1 = s1_ref[...]                                # (1, D)  = B*m1
            sum2 = s2_ref[...]                                # (1, TN) = B*m2
            m1 = sum1 * inv_B
            m2 = sum2 * inv_B
            # Unbiased per-feature std: var = (sum x^2 - B m^2) / (B - 1).
            inv_s1 = lax.rsqrt((q1_ref[...] - sum1 * m1) * inv_Bm1)   # (1, D)
            inv_s2 = lax.rsqrt((q2_ref[...] - sum2 * m2) * inv_Bm1)   # (1, TN)

            # Build the (D, TN)-shaped row/column broadcasts with two rank-1
            # MXU products whose contraction depth is padded to 8 rows (the
            # unused rows are explicit zeros).  Avoids any sublane<->lane
            # transpose of the row-form stat vectors.
            ridx_d = lax.broadcasted_iota(jnp.int32, (8, D), 0)
            ridx_n = lax.broadcasted_iota(jnp.int32, (8, block_n), 0)
            lhs8 = jnp.where(ridx_d == 0, sum1,
                             jnp.where(ridx_d == 1, inv_s1, 0.0))     # (8, D)
            rhs_mean = jnp.where(ridx_n == 0, m2, 0.0)                # (8, TN)
            rhs_scale = jnp.where(ridx_n == 1, inv_s2, 0.0)           # (8, TN)

            def outer(a, b):
                return lax.dot_general(
                    a, b, dimension_numbers=(((0,), (0,)), ((), ())),
                    preferred_element_type=jnp.float32)

            mean_corr = outer(lhs8, rhs_mean)     # (D, TN): B * m1_i * m2_j
            scale = outer(lhs8, rhs_scale)        # (D, TN): 1 / (s1_i * s2_j)

            # cross_corr = z1n^T @ z2n / batch_size
            c = (acc_ref[...] - mean_corr) * scale * inv_b

            row = lax.broadcasted_iota(jnp.int32, (D, block_n), 0)
            col = lax.broadcasted_iota(jnp.int32, (D, block_n), 1) + j * block_n
            val = jnp.where(row == col, (c - 1.0) ** 2, lam * (c * c))
            o_ref[...] = jnp.sum(val, axis=(0, 1), keepdims=True).reshape(
                1, 1, 1)

    return kernel


def _vmem_budget_bytes():
    """~75% of physical VMEM; conservative 64 MiB (v7x) fallback."""
    phys = 64 * 1024 * 1024
    try:
        phys = int(pltpu.get_tpu_info().vmem_capacity_bytes)
    except Exception:
        pass
    return (phys * 3) // 4


def _footprint_bytes(block_b, d, block_n):
    acc = d * block_n * 4                           # (D, TN) f32 accumulator
    stats = (2 * 8 * d + 2 * 8 * block_n) * 4       # sublane-padded (1, .) stats
    z1 = 2 * block_b * d * 4                        # double-buffered input slabs
    z2 = 2 * block_b * block_n * 4
    return acc + stats + z1 + z2 + (1 << 20)        # + misc headroom


def _round_down(x, m):
    return max(m, (x // m) * m)


def barlow_twins_loss_2d(z1, z2, lambda_coeff=0.005, batch_size=None,
                         block_b=None, block_n=None, mxu_dtype=None):
    """Pallas TPU forward of BarlowTwinsLoss2d.  z1, z2: (B, D)."""
    z1 = jnp.asarray(z1, jnp.float32)
    z2 = jnp.asarray(z2, jnp.float32)
    B, D = z1.shape
    assert z2.shape == (B, D)
    if batch_size is None:
        # NOTE: the torch module divides by self.batch_size (which may differ
        # from the runtime batch); we mirror that, defaulting to the actual B.
        batch_size = B

    budget = _vmem_budget_bytes()

    # ---- output column-tile width (lane axis of the (D, TN) accumulator) ----
    if block_n is not None:
        tn = int(block_n)
        assert tn == D or (D % tn == 0 and tn % 128 == 0), (
            "block_n must equal D, or divide D and be a multiple of 128")
    elif D * D * 4 <= budget // 3 or D % 128 != 0:
        tn = D            # full width: single tile, no redundant z1 re-reads
    else:
        tn = 128
        for cand in (2048, 1024, 512, 256):
            if cand < D and D % cand == 0 and D * cand * 4 <= budget // 3:
                tn = cand
                break
    grid_n = D // tn

    # ---- batch-chunk size (MXU contraction depth), sized from VMEM budget ----
    bb = min(B, 1024) if block_b is None else min(int(block_b), B)
    if bb < B:
        bb = _round_down(bb, 8)
    while bb > 8 and _footprint_bytes(bb, D, tn) > budget:
        bb = _round_down(bb // 2, 8)
    grid_k = pl.cdiv(B, bb)
    need_mask = (bb < B) and (B % bb != 0)

    if mxu_dtype is None:
        # Small D is HBM-bound: f32 MXU inputs are hidden behind the DMA and
        # keep precision; switch to bf16 only in the compute-bound regime.
        mxu_dtype = jnp.float32 if D <= 1024 else jnp.bfloat16

    vmem_limit = int(min(budget, _footprint_bytes(bb, D, tn) + (8 << 20)))
    vmem_limit = max(vmem_limit, 16 << 20)

    kernel = _make_kernel(B, D, bb, tn, lambda_coeff, 1.0 / float(batch_size),
                          mxu_dtype, need_mask)

    partials = pl.pallas_call(
        kernel,
        out_shape=jax.ShapeDtypeStruct((grid_n, 1, 1), jnp.float32),
        grid_spec=pltpu.PrefetchScalarGridSpec(
            num_scalar_prefetch=0,
            grid=(grid_n, grid_k),
            in_specs=[
                pl.BlockSpec((bb, D), lambda j, k: (k, 0)),    # z1 (full width)
                pl.BlockSpec((bb, tn), lambda j, k: (k, j)),   # z2 (column tile)
            ],
            out_specs=pl.BlockSpec((1, 1, 1), lambda j, k: (j, 0, 0)),
            scratch_shapes=[
                pltpu.VMEM((D, tn), jnp.float32),    # Gram accumulator
                pltpu.VMEM((1, D), jnp.float32),     # sum(z1)
                pltpu.VMEM((1, D), jnp.float32),     # sum(z1^2)
                pltpu.VMEM((1, tn), jnp.float32),    # sum(z2)   (current tile)
                pltpu.VMEM((1, tn), jnp.float32),    # sum(z2^2) (current tile)
            ],
        ),
        compiler_params=pltpu.CompilerParams(
            # Column-tile axis feeds v7x's second TensorCore; the batch axis is
            # the trailing reduction with resident accumulators.
            dimension_semantics=("parallel", "arbitrary"),
            vmem_limit_bytes=vmem_limit,
        ),
    )(z1, z2)
    return jnp.sum(partials)


def _reference_loss(z1, z2, lambda_coeff=0.005, batch_size=None):
    """Pure-JAX reference mirroring the PyTorch module (all f32)."""
    B, D = z1.shape
    if batch_size is None:
        batch_size = B
    z1n = (z1 - jnp.mean(z1, axis=0)) / jnp.std(z1, axis=0, ddof=1)
    z2n = (z2 - jnp.mean(z2, axis=0)) / jnp.std(z2, axis=0, ddof=1)
    c = (z1n.T @ z2n) / batch_size
    on_diag = jnp.sum((jnp.diag(c) - 1.0) ** 2)
    off_diag = jnp.sum(jnp.where(jnp.eye(D, dtype=bool), 0.0, c ** 2))
    return on_diag + lambda_coeff * off_diag


if __name__ == "__main__":
    lambda_coeff = 0.005
    key = jax.random.PRNGKey(0)
    k1, k2, k3, k4, k5, k6 = jax.random.split(key, 6)

    # Case 1: module defaults (batch=32, z_dim=128); auto tiling -> single
    # batch chunk, single column tile, f32 MXU inputs.
    B, D = 32, 128
    z1 = 1.5 * jax.random.normal(k1, (B, D), jnp.float32) + 0.3
    z2 = 0.8 * jax.random.normal(k2, (B, D), jnp.float32) - 0.1
    got = jax.block_until_ready(barlow_twins_loss_2d(z1, z2, lambda_coeff))
    want = jax.block_until_ready(_reference_loss(z1, z2, lambda_coeff))
    assert jnp.allclose(got, want, rtol=1e-2, atol=1e-2), (got, want)

    # Case 2: multi-chunk batch reduction + tail-row masking (200 % 48 != 0).
    B2, D2 = 200, 128
    z1b = jax.random.normal(k3, (B2, D2), jnp.float32) * 1.0 + 0.5
    z2b = jax.random.normal(k4, (B2, D2), jnp.float32) * 0.7 - 0.5
    got2 = jax.block_until_ready(
        barlow_twins_loss_2d(z1b, z2b, lambda_coeff, block_b=48))
    want2 = jax.block_until_ready(_reference_loss(z1b, z2b, lambda_coeff))
    assert jnp.allclose(got2, want2, rtol=1e-2, atol=1e-2), (got2, want2)

    # Case 3: column-tiled (D, TN) accumulator + "parallel" output-tile axis.
    B3, D3 = 64, 256
    z1c = jax.random.normal(k5, (B3, D3), jnp.float32) + 0.2
    z2c = jax.random.normal(k6, (B3, D3), jnp.float32) - 0.4
    got3 = jax.block_until_ready(
        barlow_twins_loss_2d(z1c, z2c, lambda_coeff, block_b=32, block_n=128))
    want3 = jax.block_until_ready(_reference_loss(z1c, z2c, lambda_coeff))
    assert jnp.allclose(got3, want3, rtol=1e-2, atol=1e-2), (got3, want3)

    print("KERNEL_OK")
</pallas_src>

<mosaic_0001>
module attributes {stable_mosaic.version = 11 : i64} {
  func.func @kernel(%arg0: i32, %arg1: i32, %arg2: memref<32x128xf32, #tpu.memory_space<vmem>>, %arg3: memref<32x128xf32, #tpu.memory_space<vmem>>, %arg4: memref<1x1x1xf32, #tpu.memory_space<vmem>>, %arg5: memref<128x128xf32, #tpu.memory_space<vmem>>, %arg6: memref<1x128xf32, #tpu.memory_space<vmem>>, %arg7: memref<1x128xf32, #tpu.memory_space<vmem>>, %arg8: memref<1x128xf32, #tpu.memory_space<vmem>>, %arg9: memref<1x128xf32, #tpu.memory_space<vmem>>) attributes {dimension_semantics = [#tpu.dimension_semantics<parallel>, #tpu.dimension_semantics<arbitrary>], iteration_bounds = array<i64: 1, 1>, scalar_prefetch = 0 : i64, scratch_operands = 5 : i64, tpu.core_type = #tpu.core_type<tc>, window_params = [{transform_indices = @transform_0, window_bounds = array<i64: 32, 128>}, {transform_indices = @transform_1, window_bounds = array<i64: 32, 128>}, {transform_indices = @transform_2, window_bounds = array<i64: 1, 1, 1>}]} {
    %c0_i32 = arith.constant 0 : i32
    %0 = arith.cmpi eq, %arg1, %c0_i32 : i32
    %1 = arith.extui %0 : i1 to i32
    %c0_i32_0 = arith.constant 0 : i32
    %2 = arith.cmpi ne, %1, %c0_i32_0 : i32
    scf.if %2 {
      %cst_30 = arith.constant 0.000000e+00 : f32
      %34 = vector.broadcast %cst_30 : f32 to vector<128x128xf32>
      %c0_31 = arith.constant 0 : index
      %c0_32 = arith.constant 0 : index
      %35 = vector.load %arg5[%c0_31, %c0_32] : memref<128x128xf32, #tpu.memory_space<vmem>>, vector<128x128xf32>
      tpu.vector_store %arg5[%c0_31, %c0_32], %34 {strides = array<i32>} : memref<128x128xf32, #tpu.memory_space<vmem>>, vector<128x128xf32>,
      %cst_33 = arith.constant 0.000000e+00 : f32
      %36 = vector.broadcast %cst_33 : f32 to vector<1x128xf32>
      %c0_34 = arith.constant 0 : index
      %c0_35 = arith.constant 0 : index
      %37 = vector.load %arg6[%c0_34, %c0_35] : memref<1x128xf32, #tpu.memory_space<vmem>>, vector<1x128xf32>
      tpu.vector_store %arg6[%c0_34, %c0_35], %36 {strides = array<i32>} : memref<1x128xf32, #tpu.memory_space<vmem>>, vector<1x128xf32>,
      %cst_36 = arith.constant 0.000000e+00 : f32
      %38 = vector.broadcast %cst_36 : f32 to vector<1x128xf32>
      %c0_37 = arith.constant 0 : index
      %c0_38 = arith.constant 0 : index
      %39 = vector.load %arg7[%c0_37, %c0_38] : memref<1x128xf32, #tpu.memory_space<vmem>>, vector<1x128xf32>
      tpu.vector_store %arg7[%c0_37, %c0_38], %38 {strides = array<i32>} : memref<1x128xf32, #tpu.memory_space<vmem>>, vector<1x128xf32>,
      %cst_39 = arith.constant 0.000000e+00 : f32
      %40 = vector.broadcast %cst_39 : f32 to vector<1x128xf32>
      %c0_40 = arith.constant 0 : index
      %c0_41 = arith.constant 0 : index
      %41 = vector.load %arg8[%c0_40, %c0_41] : memref<1x128xf32, #tpu.memory_space<vmem>>, vector<1x128xf32>
      tpu.vector_store %arg8[%c0_40, %c0_41], %40 {strides = array<i32>} : memref<1x128xf32, #tpu.memory_space<vmem>>, vector<1x128xf32>,
      %cst_42 = arith.constant 0.000000e+00 : f32
      %42 = vector.broadcast %cst_42 : f32 to vector<1x128xf32>
      %c0_43 = arith.constant 0 : index
      %c0_44 = arith.constant 0 : index
      %43 = vector.load %arg9[%c0_43, %c0_44] : memref<1x128xf32, #tpu.memory_space<vmem>>, vector<1x128xf32>
      tpu.vector_store %arg9[%c0_43, %c0_44], %42 {strides = array<i32>} : memref<1x128xf32, #tpu.memory_space<vmem>>, vector<1x128xf32>,
    } else {
    }
    %c0 = arith.constant 0 : index
    %c0_1 = arith.constant 0 : index
    %3 = vector.load %arg2[%c0, %c0_1] : memref<32x128xf32, #tpu.memory_space<vmem>>, vector<32x128xf32>
    %c0_2 = arith.constant 0 : index
    %c0_3 = arith.constant 0 : index
    %4 = vector.load %arg3[%c0_2, %c0_3] : memref<32x128xf32, #tpu.memory_space<vmem>>, vector<32x128xf32>
    %c0_4 = arith.constant 0 : index
    %c0_5 = arith.constant 0 : index
    %5 = vector.load %arg6[%c0_4, %c0_5] : memref<1x128xf32, #tpu.memory_space<vmem>>, vector<1x128xf32>
    %cst = arith.constant dense<0.000000e+00> : vector<128xf32>
    %6 = vector.multi_reduction <add>, %3, %cst [0] : vector<32x128xf32> to vector<128xf32>
    %7 = vector.shape_cast %6 : vector<128xf32> to vector<1x128xf32>
    %8 = arith.addf %5, %7 : vector<1x128xf32>
    %c0_6 = arith.constant 0 : index
    %c0_7 = arith.constant 0 : index
    %9 = vector.load %arg6[%c0_6, %c0_7] : memref<1x128xf32, #tpu.memory_space<vmem>>, vector<1x128xf32>
    tpu.vector_store %arg6[%c0_6, %c0_7], %8 {strides = array<i32>} : memref<1x128xf32, #tpu.memory_space<vmem>>, vector<1x128xf32>,
    %c0_8 = arith.constant 0 : index
    %c0_9 = arith.constant 0 : index
    %10 = vector.load %arg7[%c0_8, %c0_9] : memref<1x128xf32, #tpu.memory_space<vmem>>, vector<1x128xf32>
    %11 = arith.mulf %3, %3 : vector<32x128xf32>
    %cst_10 = arith.constant dense<0.000000e+00> : vector<128xf32>
    %12 = vector.multi_reduction <add>, %11, %cst_10 [0] : vector<32x128xf32> to vector<128xf32>
    %13 = vector.shape_cast %12 : vector<128xf32> to vector<1x128xf32>
    %14 = arith.addf %10, %13 : vector<1x128xf32>
    %c0_11 = arith.constant 0 : index
    %c0_12 = arith.constant 0 : index
    %15 = vector.load %arg7[%c0_11, %c0_12] : memref<1x128xf32, #tpu.memory_space<vmem>>, vector<1x128xf32>
    tpu.vector_store %arg7[%c0_11, %c0_12], %14 {strides = array<i32>} : memref<1x128xf32, #tpu.memory_space<vmem>>, vector<1x128xf32>,
    %c0_13 = arith.constant 0 : index
    %c0_14 = arith.constant 0 : index
    %16 = vector.load %arg8[%c0_13, %c0_14] : memref<1x128xf32, #tpu.memory_space<vmem>>, vector<1x128xf32>
    %cst_15 = arith.constant dense<0.000000e+00> : vector<128xf32>
    %17 = vector.multi_reduction <add>, %4, %cst_15 [0] : vector<32x128xf32> to vector<128xf32>
    %18 = vector.shape_cast %17 : vector<128xf32> to vector<1x128xf32>
    %19 = arith.addf %16, %18 : vector<1x128xf32>
    %c0_16 = arith.constant 0 : index
    %c0_17 = arith.constant 0 : index
    %20 = vector.load %arg8[%c0_16, %c0_17] : memref<1x128xf32, #tpu.memory_space<vmem>>, vector<1x128xf32>
    tpu.vector_store %arg8[%c0_16, %c0_17], %19 {strides = array<i32>} : memref<1x128xf32, #tpu.memory_space<vmem>>, vector<1x128xf32>,
    %c0_18 = arith.constant 0 : index
    %c0_19 = arith.constant 0 : index
    %21 = vector.load %arg9[%c0_18, %c0_19] : memref<1x128xf32, #tpu.memory_space<vmem>>, vector<1x128xf32>
    %22 = arith.mulf %4, %4 : vector<32x128xf32>
    %cst_20 = arith.constant dense<0.000000e+00> : vector<128xf32>
    %23 = vector.multi_reduction <add>, %22, %cst_20 [0] : vector<32x128xf32> to vector<128xf32>
    %24 = vector.shape_cast %23 : vector<128xf32> to vector<1x128xf32>
    %25 = arith.addf %21, %24 : vector<1x128xf32>
    %c0_21 = arith.constant 0 : index
    %c0_22 = arith.constant 0 : index
    %26 = vector.load %arg9[%c0_21, %c0_22] : memref<1x128xf32, #tpu.memory_space<vmem>>, vector<1x128xf32>
    tpu.vector_store %arg9[%c0_21, %c0_22], %25 {strides = array<i32>} : memref<1x128xf32, #tpu.memory_space<vmem>>, vector<1x128xf32>,
    %c0_23 = arith.constant 0 : index
    %c0_24 = arith.constant 0 : index
    %27 = vector.load %arg5[%c0_23, %c0_24] : memref<128x128xf32, #tpu.memory_space<vmem>>, vector<128x128xf32>
    %cst_25 = arith.constant dense<0.000000e+00> : vector<128x128xf32>
    %28 = tpu.matmul %3, %4, %cst_25 {dimension_numbers = #tpu.dot_dimension_numbers<[0], [0], [1], [1], [0, 1, 1, 1], [], []>} : vector<32x128xf32>, vector<32x128xf32>, vector<128x128xf32> -> vector<128x128xf32>
    %29 = arith.addf %27, %28 : vector<128x128xf32>
    %c0_26 = arith.constant 0 : index
    %c0_27 = arith.constant 0 : index
    %30 = vector.load %arg5[%c0_26, %c0_27] : memref<128x128xf32, #tpu.memory_space<vmem>>, vector<128x128xf32>
    tpu.vector_store %arg5[%c0_26, %c0_27], %29 {strides = array<i32>} : memref<128x128xf32, #tpu.memory_space<vmem>>, vector<128x128xf32>,
    %c0_i32_28 = arith.constant 0 : i32
    %31 = arith.cmpi eq, %arg1, %c0_i32_28 : i32
    %32 = arith.extui %31 : i1 to i32
    %c0_i32_29 = arith.constant 0 : i32
    %33 = arith.cmpi ne, %32, %c0_i32_29 : i32
    scf.if %33 {
      %c0_30 = arith.constant 0 : index
      %c0_31 = arith.constant 0 : index
      %34 = vector.load %arg6[%c0_30, %c0_31] : memref<1x128xf32, #tpu.memory_space<vmem>>, vector<1x128xf32>
      %c0_32 = arith.constant 0 : index
      %c0_33 = arith.constant 0 : index
      %35 = vector.load %arg8[%c0_32, %c0_33] : memref<1x128xf32, #tpu.memory_space<vmem>>, vector<1x128xf32>
      %cst_34 = arith.constant 3.125000e-02 : f32
      %36 = vector.broadcast %cst_34 : f32 to vector<1x128xf32>
      %37 = arith.mulf %34, %36 : vector<1x128xf32>
      %cst_35 = arith.constant 3.125000e-02 : f32
      %38 = vector.broadcast %cst_35 : f32 to vector<1x128xf32>
      %39 = arith.mulf %35, %38 : vector<1x128xf32>
      %c0_36 = arith.constant 0 : index
      %c0_37 = arith.constant 0 : index
      %40 = vector.load %arg7[%c0_36, %c0_37] : memref<1x128xf32, #tpu.memory_space<vmem>>, vector<1x128xf32>
      %41 = arith.mulf %34, %37 : vector<1x128xf32>
      %42 = arith.subf %40, %41 : vector<1x128xf32>
      %cst_38 = arith.constant 0.0322580636 : f32
      %43 = vector.broadcast %cst_38 : f32 to vector<1x128xf32>
      %44 = arith.mulf %42, %43 : vector<1x128xf32>
      %45 = math.rsqrt %44 : vector<1x128xf32>
      %c0_39 = arith.constant 0 : index
      %c0_40 = arith.constant 0 : index
      %46 = vector.load %arg9[%c0_39, %c0_40] : memref<1x128xf32, #tpu.memory_space<vmem>>, vector<1x128xf32>
      %47 = arith.mulf %35, %39 : vector<1x128xf32>
      %48 = arith.subf %46, %47 : vector<1x128xf32>
      %cst_41 = arith.constant 0.0322580636 : f32
      %49 = vector.broadcast %cst_41 : f32 to vector<1x128xf32>
      %50 = arith.mulf %48, %49 : vector<1x128xf32>
      %51 = math.rsqrt %50 : vector<1x128xf32>
      %52 = tpu.iota {dimensions = array<i32: 0>} : vector<8x128xi32>
      %53 = tpu.iota {dimensions = array<i32: 0>} : vector<8x128xi32>
      %c0_i32_42 = arith.constant 0 : i32
      %54 = vector.broadcast %c0_i32_42 : i32 to vector<8x128xi32>
      %55 = arith.cmpi eq, %52, %54 : vector<8x128xi32>
      %c1_i32 = arith.constant 1 : i32
      %56 = vector.broadcast %c1_i32 : i32 to vector<8x128xi32>
      %57 = arith.cmpi eq, %52, %56 : vector<8x128xi32>
      %cst_43 = arith.constant 0.000000e+00 : f32
      %58 = vector.shape_cast %45 : vector<1x128xf32> to vector<1x128xf32>
      %59 = vector.broadcast %58 : vector<1x128xf32> to vector<8x128xf32>
      %60 = vector.broadcast %cst_43 : f32 to vector<8x128xf32>
      %61 = arith.select %57, %59, %60 : vector<8x128xi1>, vector<8x128xf32>
      %62 = vector.shape_cast %34 : vector<1x128xf32> to vector<1x128xf32>
      %63 = vector.broadcast %62 : vector<1x128xf32> to vector<8x128xf32>
      %64 = arith.select %55, %63, %61 : vector<8x128xi1>, vector<8x128xf32>
      %c0_i32_44 = arith.constant 0 : i32
      %65 = vector.broadcast %c0_i32_44 : i32 to vector<8x128xi32>
      %66 = arith.cmpi eq, %53, %65 : vector<8x128xi32>
      %cst_45 = arith.constant 0.000000e+00 : f32
      %67 = vector.shape_cast %39 : vector<1x128xf32> to vector<1x128xf32>
      %68 = vector.broadcast %67 : vector<1x128xf32> to vector<8x128xf32>
      %69 = vector.broadcast %cst_45 : f32 to vector<8x128xf32>
      %70 = arith.select %66, %68, %69 : vector<8x128xi1>, vector<8x128xf32>
      %c1_i32_46 = arith.constant 1 : i32
      %71 = vector.broadcast %c1_i32_46 : i32 to vector<8x128xi32>
      %72 = arith.cmpi eq, %53, %71 : vector<8x128xi32>
      %cst_47 = arith.constant 0.000000e+00 : f32
      %73 = vector.shape_cast %51 : vector<1x128xf32> to vector<1x128xf32>
      %74 = vector.broadcast %73 : vector<1x128xf32> to vector<8x128xf32>
      %75 = vector.broadcast %cst_47 : f32 to vector<8x128xf32>
      %76 = arith.select %72, %74, %75 : vector<8x128xi1>, vector<8x128xf32>
      %cst_48 = arith.constant dense<0.000000e+00> : vector<128x128xf32>
      %77 = tpu.matmul %64, %70, %cst_48 {dimension_numbers = #tpu.dot_dimension_numbers<[0], [0], [1], [1], [0, 1, 1, 1], [], []>} : vector<8x128xf32>, vector<8x128xf32>, vector<128x128xf32> -> vector<128x128xf32>
      %cst_49 = arith.constant dense<0.000000e+00> : vector<128x128xf32>
      %78 = tpu.matmul %64, %76, %cst_49 {dimension_numbers = #tpu.dot_dimension_numbers<[0], [0], [1], [1], [0, 1, 1, 1], [], []>} : vector<8x128xf32>, vector<8x128xf32>, vector<128x128xf32> -> vector<128x128xf32>
      %c0_50 = arith.constant 0 : index
      %c0_51 = arith.constant 0 : index
      %79 = vector.load %arg5[%c0_50, %c0_51] : memref<128x128xf32, #tpu.memory_space<vmem>>, vector<128x128xf32>
      %80 = arith.subf %79, %77 : vector<128x128xf32>
      %81 = arith.mulf %80, %78 : vector<128x128xf32>
      %cst_52 = arith.constant 3.125000e-02 : f32
      %82 = vector.broadcast %cst_52 : f32 to vector<128x128xf32>
      %83 = arith.mulf %81, %82 : vector<128x128xf32>
      %84 = tpu.iota {dimensions = array<i32: 0>} : vector<128x128xi32>
      %85 = tpu.iota {dimensions = array<i32: 1>} : vector<128x128xi32>
      %c128_i32 = arith.constant 128 : i32
      %86 = arith.muli %arg0, %c128_i32 : i32
      %87 = vector.broadcast %86 : i32 to vector<128x128xi32>
      %88 = arith.addi %85, %87 : vector<128x128xi32>
      %89 = arith.cmpi eq, %84, %88 : vector<128x128xi32>
      %cst_53 = arith.constant 1.000000e+00 : f32
      %90 = vector.broadcast %cst_53 : f32 to vector<128x128xf32>
      %91 = arith.subf %83, %90 : vector<128x128xf32>
      %92 = arith.mulf %91, %91 : vector<128x128xf32>
      %93 = arith.mulf %83, %83 : vector<128x128xf32>
      %cst_54 = arith.constant 5.000000e-03 : f32
      %94 = vector.broadcast %cst_54 : f32 to vector<128x128xf32>
      %95 = arith.mulf %94, %93 : vector<128x128xf32>
      %96 = arith.select %89, %92, %95 : vector<128x128xi1>, vector<128x128xf32>
      %97 = vector.shape_cast %96 : vector<128x128xf32> to vector<1x128x128xf32>
      %cst_55 = arith.constant dense<0.000000e+00> : vector<1xf32>
      %98 = vector.multi_reduction <add>, %97, %cst_55 [1, 2] : vector<1x128x128xf32> to vector<1xf32>
      %99 = vector.shape_cast %98 : vector<1xf32> to vector<1x1x1xf32>
      %100 = vector.extract %99[0, 0, 0] : f32 from vector<1x1x1xf32>
      %101 = vector.broadcast %100 : f32 to vector<1x1xf32>
      %102 = vector.shape_cast %101 : vector<1x1xf32> to vector<1x1x1xf32>
      %c0_56 = arith.constant 0 : index
      %c0_57 = arith.constant 0 : index
      %c0_58 = arith.constant 0 : index
      %103 = vector.load %arg4[%c0_56, %c0_57, %c0_58] : memref<1x1x1xf32, #tpu.memory_space<vmem>>, vector<1x1x1xf32>
      tpu.vector_store %arg4[%c0_56, %c0_57, %c0_58], %102 {strides = array<i32>} : memref<1x1x1xf32, #tpu.memory_space<vmem>>, vector<1x1x1xf32>,
    } else {
    }
    return
  }
  func.func @transform_0(%arg0: i32, %arg1: i32) -> (i32, i32) {
    %c0_i32 = arith.constant 0 : i32
    %c0_i32_0 = arith.constant 0 : i32
    return %arg1, %c0_i32 : i32, i32
  }
  func.func @transform_1(%arg0: i32, %arg1: i32) -> (i32, i32) {
    %c0_i32 = arith.constant 0 : i32
    return %arg1, %arg0 : i32, i32
  }
  func.func @transform_2(%arg0: i32, %arg1: i32) -> (i32, i32, i32) {
    %c0_i32 = arith.constant 0 : i32
    %c0_i32_0 = arith.constant 0 : i32
    %c0_i32_1 = arith.constant 0 : i32
    return %arg0, %c0_i32, %c0_i32_0 : i32, i32, i32
  }
}

</mosaic_0001>

<bundles_post_ra>
// kernel: tpu_custom_call.1
= control target key start
LH: loop header
LB: loop body
LE: loop exit
PB: predicated region body
PF: predicated region fallthrough
CT: control target
= control target key end

     0   :  { %7 = vsyncpa [#allocation8], 0  ;;  %s1688_s0 = inlined_call_operand.hbm [shape: f32[32,128], index: 0, kind: input, shape index: {}]   ;;  %s1689_s1 = inlined_call_operand.hbm [shape: f32[32,128], index: 1, kind: input, shape index: {}]   ;;  %s1690_s2 = inlined_call_operand.hbm [shape: f32[1,1,1], index: 2, kind: output, shape index: {}]  }
   0x1   :  { %8 = vsyncpa [#allocation11], 0 }
   0x2   :  { %9 = vsyncpa [#allocation9], 0  ;;  %s1343_s9 = smov [#allocation7]   ;;  %s1271_s13 = scalar_lea.hbm %s1688_s0, 512 }
   0x3   :  { %s15_s10 = sshll.u32 %s1343_s9, 4  ;;  %p1272_p0 = scmp.ne.s32.totalorder %s1688_s0, %s1271_s13  ;;  %s16_s10 = int_to_ptr.vmem [resolvable:$true] %s15_s10 }
   0x4   :  { %p1275_p1 = scmp.lt.u32.totalorder %s1271_s13, %s1688_s0 }
   0x6   :  { %p1277_p2 = pnand %p1275_p1, %p1272_p0 }
   0x8   :  { %1280 = shalt.err (!%p1277_p2)
}
   0x9   :  { %s1281_s18 = scalar_lea.vmem %s16_s10, 512  ;;  %p1286_p4 = scmp.lt.s32.totalorder %s16_s10, %s16_s10 }
   0xa   :  { %p1282_p3 = scmp.ne.s32.totalorder %s16_s10, %s1281_s18  ;;  %p1287_p5 = scmp.lt.s32.totalorder %s1281_s18, %s1281_s18 }
   0xc   :  { %p1288_p6 = por %p1287_p5, %p1286_p4 }
   0xe   :  { %p1289_p7 = pnand %p1288_p6, %p1282_p3 }
  0x10   :  { %1292 = shalt.err (!%p1289_p7)
}
  0x11   :  { %s1344_s19 = smov 128   ;;  %s1345_s20 = smov 8  }
  0x12   :  { %21 = dma.hbm_to_vmem [thread:$0]  %s1688_s0, 512, %s16_s10, [#allocation8], %s1344_s19, %s1344_s19, %s1345_s20  }
  0x13   :  { %s1346_s23 = smov [#allocation10]   ;;  %s1293_s27 = scalar_lea.hbm %s1689_s1, 512 }
  0x14   :  { %s27_s24 = sshll.u32 %s1346_s23, 4  ;;  %p1294_p8 = scmp.ne.s32.totalorder %s1689_s1, %s1293_s27  ;;  %s28_s24 = int_to_ptr.vmem [resolvable:$true] %s27_s24 }
  0x15   :  { %p1297_p9 = scmp.lt.u32.totalorder %s1293_s27, %s1689_s1 }
  0x17   :  { %p1299_p10 = pnand %p1297_p9, %p1294_p8 }
  0x19   :  { %1302 = shalt.err (!%p1299_p10)
}
  0x1a   :  { %s1303_s4 = scalar_lea.vmem %s28_s24, 512  ;;  %p1308_p12 = scmp.lt.s32.totalorder %s28_s24, %s28_s24 }
  0x1b   :  { %p1304_p11 = scmp.ne.s32.totalorder %s28_s24, %s1303_s4  ;;  %p1309_p13 = scmp.lt.s32.totalorder %s1303_s4, %s1303_s4 }
  0x1d   :  { %p1310_p0 = por %p1309_p13, %p1308_p12 }
  0x1f   :  { %p1311_p1 = pnand %p1310_p0, %p1304_p11 }
  0x21   :  { %1314 = shalt.err (!%p1311_p1)
}
  0x22   :  { %33 = dma.hbm_to_vmem [thread:$0]  %s1689_s1, 512, %s28_s24, [#allocation11], %s1344_s19, %s1344_s19, %s1345_s20  }
  0x23   :  { %1337 = dma.done.wait [#allocation8], 512  }
  0x24   :  { %1338 = vsyncadd [#allocation8], 4294966784 }
  0x25   :  { %1339 = dma.done.wait [#allocation11], 512  }
  0x26   :  { %1340 = vsyncadd [#allocation11], 4294966784  ;;  %v1347_v0 = vmov 0.0   ;;  %v64_v1 = vld [vmem:[#allocation7] sm:$0xff]  ;;  %v65_v2 = vld [vmem:[#allocation7 + $0x8] sm:$0xff]  ;;  %v419_v54 = vlaneseq  ;;  %vm176_vm2 = vcmask 261120  }
  0x27   :  { %60 = vst [vmem:[#allocation3] sm:$0x1] %v1347_v0  ;;  %61 = vst [vmem:[#allocation4] sm:$0x1] %v1347_v0  ;;  %v66_v3 = vld [vmem:[#allocation7 + $0x10] sm:$0xff]  ;;  %144 = vxpose.xlu0.b32.start [1/4] (short) %v64_v1, 128  ;;  %v85_v4 = vmul.f32 %v64_v1, %v64_v1  ;;  %v86_v5 = vmul.f32 %v65_v2, %v65_v2  ;;  %v73_v6 = vadd.f32 %v65_v2, %v64_v1  ;;  %v67_v8 = vld [vmem:[#allocation7 + $0x18] sm:$0xff] }
  0x28   :  { %62 = vst [vmem:[#allocation5] sm:$0x1] %v1347_v0  ;;  %63 = vst [vmem:[#allocation6] sm:$0x1] %v1347_v0  ;;  %v87_v7 = vmul.f32 %v66_v3, %v66_v3  ;;  %v88_v11 = vmul.f32 %v67_v8, %v67_v8  ;;  %v68_v31 = vld [vmem:[#allocation10] sm:$0xff]  ;;  %v69_v32 = vld [vmem:[#allocation10 + $0x8] sm:$0xff] }
  0x29   :  { %v89_v9 = vadd.f32 %v86_v5, %v85_v4  ;;  %v74_v10 = vadd.f32 %v73_v6, %v66_v3  ;;  %v1249_v33 = vpack.c.bf16 %v69_v32, %v68_v31  ;;  %v101_v34 = vadd.f32 %v69_v32, %v68_v31  ;;  %v70_v38 = vld [vmem:[#allocation10 + $0x10] sm:$0xff]  ;;  %v71_v39 = vld [vmem:[#allocation10 + $0x18] sm:$0xff]  ;;  %s1348_s1 = smov [#allocation12]  }
  0x2a   :  { %v113_v35 = vmul.f32 %v68_v31, %v68_v31  ;;  %v114_v36 = vmul.f32 %v69_v32, %v69_v32  ;;  %v1253_v41 = vpack.c.bf16 %v71_v39, %v70_v38  ;;  %v115_v44 = vmul.f32 %v70_v38, %v70_v38  ;;  %s1035_s6 = sshll.u32 %s1348_s1, 4  ;;  %s1036_s6 = int_to_ptr.vmem [resolvable:$true] %s1035_s6 }
  0x2b   :  { %145 = vxpose.xlu0.b32.cont [2/4] (short) %v65_v2, 128  ;;  %v90_v12 = vadd.f32 %v89_v9, %v87_v7  ;;  %v75_v13 = vadd.f32 %v74_v10, %v67_v8  ;;  %1250 = vmatprep.subr.bf16.mxu0 %v1249_v33  ;;  %v102_v43 = vadd.f32 %v101_v34, %v70_v38  ;;  %v1389_v59 = vshrl.u32 %v419_v54, 7  ;;  %s1315_s8 = scalar_lea.vmem %s1036_s6, 16  ;;  %s1319_s9 = scalar_lea.vmem %s1036_s6, 32 }
  0x2c   :  { %v117_v37 = vadd.f32 %v114_v36, %v113_v35  ;;  %1252 = vmatpush3.bf16.msra.mxu0 %v1249_v33  ;;  %v116_v46 = vmul.f32 %v71_v39, %v71_v39  ;;  %vm483_vm3 = vcmask 64512   ;;  %p1316_p2 = scmp.ne.s32.totalorder %s1036_s6, %s1315_s8  ;;  %p1320_p3 = scmp.lt.s32.totalorder %s1036_s6, %s1036_s6 }
  0x2d   :  { %v76_v14 = vrot.slane %v75_v13, 4  ;;  %v91_v15 = vadd.f32 %v90_v12, %v88_v11  ;;  %1254 = vmatprep.subr.bf16.mxu0 %v1253_v41  ;;  %v103_v48 = vadd.f32 %v102_v43, %v71_v39  ;;  %v426_v1 = vsub.s32 0, %v1389_v59  ;;  %p1321_p4 = scmp.lt.s32.totalorder %s1319_s9, %s1315_s8 }
  0x2e   :  { %v72_v24 = vld [vmem:[#allocation3] sm:$0x1]  ;;  %v84_v27 = vld [vmem:[#allocation4] sm:$0x1]  ;;  %v118_v49 = vadd.f32 %v117_v37, %v115_v44  ;;  %vm422_vm0 = vcmp.eq.s32.totalorder %v1389_v59, 1  ;;  %vm421_vm1 = vcmp.eq.s32.totalorder %v1389_v59, 0 }
  0x2f   :  { %146 = vxpose.xlu0.b32.cont [3/4] (short) %v66_v3, 128  ;;  %v77_v16 = vadd.f32 %v76_v14, %v75_v13  ;;  %v92_v17 = vrot.slane %v91_v15, 4  ;;  %v104_v51 = vrot.slane %v103_v48, 4  ;;  %v100_v0 = vld [vmem:[#allocation5] sm:$0x1]  ;;  %v112_v4 = vld [vmem:[#allocation6] sm:$0x1]  ;;  %p1322_p5 = por %p1321_p4, %p1320_p3 }
  0x30   :  { %1256 = vmatpush3.bf16.msra.mxu0 %v1253_v41  ;;  %v119_v52 = vadd.f32 %v118_v49, %v116_v46 }
  0x31   :  { %v78_v18 = vrot.slane %v77_v16, 2  ;;  %v93_v19 = vadd.f32 %v92_v17, %v91_v15  ;;  %v105_v55 = vadd.f32 %v104_v51, %v103_v48  ;;  %p1323_p6 = pnand %p1322_p5, %p1316_p2 }
  0x32   :  { %v120_v56 = vrot.slane %v119_v52, 4 }
  0x33   :  { %147 = vxpose.xlu0.b32.end [4/4] (short) %v67_v8, 128  ;;  %v79_v20 = vadd.f32 %v78_v18, %v77_v16  ;;  %v94_v21 = vrot.slane %v93_v19, 2  ;;  %v106_v57 = vrot.slane %v105_v55, 2 }
  0x34   :  { %v121_v58 = vadd.f32 %v120_v56, %v119_v52 }
  0x35   :  { %v80_v22 = vrot.slane %v79_v20, 1  ;;  %v95_v23 = vadd.f32 %v94_v21, %v93_v19  ;;  %v107_v60 = vadd.f32 %v106_v57, %v105_v55 }
  0x36   :  { %v122_v61 = vrot.slane %v121_v58, 2 }
  0x37   :  { %v81_v25 = vadd.f32 %v80_v22, %v79_v20  ;;  %v96_v26 = vrot.slane %v95_v23, 1  ;;  %v108_v62 = vrot.slane %v107_v60, 1 }
  0x38   :  { %v123_v63 = vadd.f32 %v122_v61, %v121_v58 }
  0x39   :  { %v82_v28 = vadd.f32 %v81_v25, %v72_v24  ;;  %v97_v29 = vadd.f32 %v96_v26, %v95_v23  ;;  %v109_v2 = vadd.f32 %v108_v62, %v107_v60 }
  0x3a   :  { %v124_v3 = vrot.slane %v123_v63, 1 }
  0x3b   :  { %83 = vst [vmem:[#allocation3] sm:$0x1] %v82_v28  ;;  %v98_v30 = vadd.f32 %v97_v29, %v84_v27  ;;  %v110_v5 = vadd.f32 %v109_v2, %v100_v0 }
  0x3c   :  { %v125_v6 = vadd.f32 %v124_v3, %v123_v63 }
  0x3d   :  { %99 = vst [vmem:[#allocation4] sm:$0x1] %v98_v30  ;;  %111 = vst [vmem:[#allocation5] sm:$0x1] %v110_v5 }
  0x3e   :  { %v126_v9 = vadd.f32 %v125_v6, %v112_v4 }
  0x40   :  { %127 = vst [vmem:[#allocation6] sm:$0x1] %v126_v9 }
  0x42   :  { %v405_v40 = vld [vmem:[#allocation3] sm:$0x1] }
  0x43   :  { %v407_v42 = vmul.f32 0.03125, %v405_v40  ;;  %v434_v8 = vrot.slane %v405_v40, %v426_v1 }
  0x44   :  { %v409_v45 = vld [vmem:[#allocation4] sm:$0x1]  ;;  %v406_v13 = vld [vmem:[#allocation5] sm:$0x1] }
  0x45   :  { %v410_v47 = vmul.f32 %v407_v42, %v405_v40  ;;  %v408_v14 = vmul.f32 0.03125, %v406_v13 }
  0x47   :  { %v411_v50 = vsub.f32 %v409_v45, %v410_v47  ;;  %v441_v15 = vrot.slane %v408_v14, %v426_v1  ;;  %v415_v16 = vmul.f32 %v408_v14, %v406_v13  ;;  %v414_v17 = vld [vmem:[#allocation6] sm:$0x1] }
  0x49   :  { %v412_v53 = vmul.f32 0.032258064, %v411_v50  ;;  %1197 = vmatprep.subr.msk.mxu0 %vm421_vm1, %v441_v15  ;;  %1257 = vmatprep.subr.msk.mxu1 %vm421_vm1, %v441_v15  ;;  %v416_v18 = vsub.f32 %v414_v17, %v415_v16 }
  0x4a   :  { %1258 = vmatpush3.msk.msra.mxu1 %vm421_vm1, %v441_v15 }
  0x4b   :  { %1267 = vrsqrt.f32 %v412_v53  ;;  %v417_v19 = vmul.f32 0.032258064, %v416_v18 }
  0x4d   :  { %1269 = vrsqrt.f32 %v417_v19 }
  0x55   :  { %v1268_v7 = vpop.eup %1267 }
  0x56   :  { %v427_v10 = vrot.slane %v1268_v7, %v426_v1 }
  0x57   :  { %v1270_v20 = vpop.eup %1269 }
  0x58   :  { %v429_v11 = vsel %vm422_vm0, %v427_v10, 0.0  ;;  %v448_v21 = vrot.slane %v1270_v20, %v426_v1 }
  0x59   :  { %v436_v12 = vsel %vm421_vm1, %v434_v8, %v429_v11 }
  0x5a   :  { %451 = vxpose.xlu1.b32.start.end [1/1] (short) %v436_v12, 128  ;;  %1223 = vmatprep.subr.msk.mxu1 %vm422_vm0, %v448_v21 }
  0xa7   :  { %v160_v22 = vpop.trf.xlu0 }
  0xa8   :  { %1173 = vmatprep.mubr.msk.f32.mxu0 %vm176_vm2, %v160_v22 }
  0xab   :  { %v161_v23 = vpop.trf.xlu0 }
  0xac   :  { %1174 = vmatmul.mubr.msk.f32.vlgmr.msra.gmra.mrb[0].mxu0 %vm176_vm2, %v161_v23 }
  0xad   :  { %1198 = vmatpush3.msk.msra.mxu0 %vm421_vm1, %v441_v15 }
  0xaf   :  { %v162_v24 = vpop.trf.xlu0 }
  0xb0   :  { %1176 = vmatprep.mubr.msk.f32.mxu0 %vm176_vm2, %v162_v24 }
  0xb3   :  { %v163_v25 = vpop.trf.xlu0 }
  0xb4   :  { %1177 = vmatmul.mubr.msk.f32.gmra.mrb[2].mxu0 %vm176_vm2, %v163_v25 }
  0xb7   :  { %v164_v26 = vpop.trf.xlu0 }
  0xb8   :  { %1179 = vmatprep.mubr.msk.f32.mxu0 %vm176_vm2, %v164_v26 }
  0xbb   :  { %v165_v27 = vpop.trf.xlu0 }
  0xbc   :  { %1180 = vmatmul.mubr.msk.f32.gmra.mrb[4].mxu0 %vm176_vm2, %v165_v27 }
  0xbf   :  { %v166_v28 = vpop.trf.xlu0 }
  0xc0   :  { %1182 = vmatprep.mubr.msk.f32.mxu0 %vm176_vm2, %v166_v28 }
  0xc3   :  { %v167_v29 = vpop.trf.xlu0 }
  0xc4   :  { %1183 = vmatmul.mubr.msk.f32.gmra.mrb[6].mxu0 %vm176_vm2, %v167_v29 }
  0xc7   :  { %v168_v30 = vpop.trf.xlu0 }
  0xc8   :  { %1185 = vmatprep.mubr.msk.f32.mxu0 %vm176_vm2, %v168_v30 }
  0xcb   :  { %v169_v31 = vpop.trf.xlu0 }
  0xcc   :  { %1186 = vmatmul.mubr.msk.f32.gmra.mrb[8].mxu0 %vm176_vm2, %v169_v31 }
  0xcf   :  { %v170_v32 = vpop.trf.xlu0 }
  0xd0   :  { %1188 = vmatprep.mubr.msk.f32.mxu0 %vm176_vm2, %v170_v32 }
  0xd3   :  { %v171_v33 = vpop.trf.xlu0 }
  0xd4   :  { %1189 = vmatmul.mubr.msk.f32.gmra.mrb[10].mxu0 %vm176_vm2, %v171_v33 }
  0xd7   :  { %v172_v34 = vpop.trf.xlu0 }
  0xd8   :  { %1191 = vmatprep.mubr.msk.f32.mxu0 %vm176_vm2, %v172_v34 }
  0xda   :  { %v467_v35 = vpop.trf.xlu1 }
  0xdb   :  { %v173_v36 = vpop.trf.xlu0 }
  0xdc   :  { %1192 = vmatmul.mubr.msk.f32.gmra.mrb[12].mxu0 %vm176_vm2, %v173_v36 }
  0xde   :  { %v468_v37 = vpop.trf.xlu1 }
  0xdf   :  { %v174_v38 = vpop.trf.xlu0 }
  0xe0   :  { %1194 = vmatprep.mubr.msk.f32.mxu0 %vm176_vm2, %v174_v38 }
  0xe2   :  { %v469_v39 = vpop.trf.xlu1 }
  0xe3   :  { %v175_v40 = vpop.trf.xlu0 }
  0xe4   :  { %1195 = vmatmul.mubr.msk.f32.gmra.mrb[14].mxu0 %vm176_vm2, %v175_v40  ;;  %v886_v40 = vadd.s32 8, %v1389_v59 }
  0xe5   :  { %1199 = vmatprep.mubr.msk.f32.mxu0 %vm483_vm3, %v467_v35 }
  0xe6   :  { %v470_v41 = vpop.trf.xlu1 }
  0xe8   :  { %1200 = vmatmul.mubr.msk.f32.vlgmr.msra.gmra.mrb[16].mxu0 %vm483_vm3, %v468_v37 }
  0xe9   :  { %1202 = vmatprep.mubr.msk.f32.mxu0 %vm483_vm3, %v469_v39 }
  0xea   :  { %v471_v42 = vpop.trf.xlu1 }
  0xec   :  { %1203 = vmatmul.mubr.msk.f32.gmra.mrb[18].mxu0 %vm483_vm3, %v470_v41 }
  0xed   :  { %1205 = vmatprep.mubr.msk.f32.mxu0 %vm483_vm3, %v471_v42 }
  0xee   :  { %v472_v43 = vpop.trf.xlu1 }
  0xf0   :  { %1206 = vmatmul.mubr.msk.f32.gmra.mrb[20].mxu0 %vm483_vm3, %v472_v43 }
  0xf2   :  { %v473_v44 = vpop.trf.xlu1 }
  0xf3   :  { %1208 = vmatprep.mubr.msk.f32.mxu1 %vm483_vm3, %v473_v44 }
  0xf6   :  { %v474_v45 = vpop.trf.xlu1 }
  0xf7   :  { %1209 = vmatmul.mubr.msk.f32.vlgmr.msra.gmra.mrb[0].mxu1 %vm483_vm3, %v474_v45 }
  0xf8   :  { %1224 = vmatpush3.msk.msra.mxu1 %vm422_vm0, %v448_v21 }
  0xfa   :  { %v475_v46 = vpop.trf.xlu1 }
  0xfb   :  { %1211 = vmatprep.mubr.msk.f32.mxu1 %vm483_vm3, %v475_v46 }
  0xfe   :  { %v476_v47 = vpop.trf.xlu1 }
  0xff   :  { %1212 = vmatmul.mubr.msk.f32.gmra.mrb[2].mxu1 %vm483_vm3, %v476_v47 }
 0x102   :  { %v477_v48 = vpop.trf.xlu1 }
 0x103   :  { %1214 = vmatprep.mubr.msk.f32.mxu1 %vm483_vm3, %v477_v48 }
 0x106   :  { %v478_v49 = vpop.trf.xlu1 }
 0x107   :  { %1215 = vmatmul.mubr.msk.f32.gmra.mrb[4].mxu1 %vm483_vm3, %v478_v49 }
 0x10a   :  { %v479_v50 = vpop.trf.xlu1 }
 0x10b   :  { %1217 = vmatprep.mubr.msk.f32.mxu1 %vm483_vm3, %v479_v50 }
 0x10e   :  { %v480_v51 = vpop.trf.xlu1 }
 0x10f   :  { %1218 = vmatmul.mubr.msk.f32.gmra.mrb[6].mxu1 %vm483_vm3, %v480_v51 }
 0x112   :  { %v481_v52 = vpop.trf.xlu1 }
 0x113   :  { %1220 = vmatprep.mubr.msk.f32.mxu1 %vm483_vm3, %v481_v52 }
 0x116   :  { %v482_v53 = vpop.trf.xlu1 }
 0x117   :  { %1221 = vmatmul.mubr.msk.f32.gmra.mrb[8].mxu1 %vm483_vm3, %v482_v53 }
 0x118   :  { %1225 = vmatprep.mubr.msk.f32.mxu1 %vm483_vm3, %v467_v35 }
 0x11b   :  { %1226 = vmatmul.mubr.msk.f32.vlgmr.msra.gmra.mrb[10].mxu1 %vm483_vm3, %v468_v37 }
 0x11c   :  { %1228 = vmatprep.mubr.msk.f32.mxu1 %vm483_vm3, %v469_v39 }
 0x11f   :  { %1229 = vmatmul.mubr.msk.f32.gmra.mrb[12].mxu1 %vm483_vm3, %v470_v41  ;;  %v1538_v41 = vand.u32 127, %v419_v54 }
 0x120   :  { %1231 = vmatprep.mubr.msk.f32.mxu1 %vm483_vm3, %v471_v42 }
 0x121   :  { %vm907_vm4 = vcmp.eq.s32.totalorder %v886_v40, %v1538_v41  ;;  %vm906_vm5 = vcmp.eq.s32.totalorder %v1389_v59, %v1538_v41 }
 0x123   :  { %1232 = vmatmul.mubr.msk.f32.gmra.mrb[14].mxu1 %vm483_vm3, %v472_v43  ;;  %v887_v43 = vadd.s32 16, %v1389_v59 }
 0x124   :  { %1234 = vmatprep.mubr.msk.f32.mxu1 %vm483_vm3, %v473_v44 }
 0x125   :  { %vm908_vm6 = vcmp.eq.s32.totalorder %v887_v43, %v1538_v41 }
 0x127   :  { %1235 = vmatmul.mubr.msk.f32.gmra.mrb[16].mxu1 %vm483_vm3, %v474_v45 }
 0x128   :  { %1237 = vmatprep.mubr.msk.f32.mxu1 %vm483_vm3, %v475_v46  ;;  %v1542_v46 = vadd.s32 24, %v1389_v59 }
 0x12a   :  { %vm909_vm7 = vcmp.eq.s32.totalorder %v1542_v46, %v1538_v41 }
 0x12b   :  { %1238 = vmatmul.mubr.msk.f32.gmra.mrb[18].mxu1 %vm483_vm3, %v476_v47 }
 0x12c   :  { %1240 = vmatprep.mubr.msk.f32.mxu1 %vm483_vm3, %v477_v48 }
 0x12f   :  { %1241 = vmatmul.mubr.msk.f32.gmra.mrb[20].mxu1 %vm483_vm3, %v478_v49  ;;  %v1546_v49 = vadd.s32 32, %v1389_v59 }
 0x130   :  { %1243 = vmatprep.mubr.msk.f32.mxu1 %vm483_vm3, %v479_v50 }
 0x131   :  { %vm910_vm8 = vcmp.eq.s32.totalorder %v1546_v49, %v1538_v41 }
 0x133   :  { %1244 = vmatmul.mubr.msk.f32.gmra.mrb[22].mxu1 %vm483_vm3, %v480_v51  ;;  %v1552_v51 = vadd.s32 40, %v1389_v59 }
 0x134   :  { %1246 = vmatprep.mubr.msk.f32.mxu1 %vm483_vm3, %v481_v52 }
 0x135   :  { %vm911_vm9 = vcmp.eq.s32.totalorder %v1552_v51, %v1538_v41 }
 0x137   :  { %1247 = vmatmul.mubr.msk.f32.gmra.mrb[24].mxu1 %vm483_vm3, %v482_v53 }
 0x17f   :  { %v1175_v55 = vpop.f32.mrb[0].mxu0 }
 0x180   :  { %v291_v56 = vpop.f32.mrb[1].mxu0 }
 0x187   :  { %v1458_v57 = vpop.f32.mrb[2].mxu0 }
 0x188   :  { %v1460_v58 = vpop.f32.mrb[3].mxu0 }
 0x18f   :  { %v1462_v60 = vpop.f32.mrb[4].mxu0 }
 0x190   :  { %v1464_v61 = vpop.f32.mrb[5].mxu0 }
 0x197   :  { %v1466_v62 = vpop.f32.mrb[6].mxu0 }
 0x198   :  { %v1468_v63 = vpop.f32.mrb[7].mxu0 }
 0x19f   :  { %v1470_v0 = vpop.f32.mrb[8].mxu0 }
 0x1a0   :  { %v1472_v1 = vpop.f32.mrb[9].mxu0 }
 0x1a7   :  { %v1474_v2 = vpop.f32.mrb[10].mxu0 }
 0x1a8   :  { %v1476_v3 = vpop.f32.mrb[11].mxu0 }
 0x1af   :  { %v1478_v4 = vpop.f32.mrb[12].mxu0 }
 0x1b0   :  { %v1480_v5 = vpop.f32.mrb[13].mxu0 }
 0x1b7   :  { %v1482_v6 = vpop.f32.mrb[14].mxu0 }
 0x1b8   :  { %v1484_v7 = vpop.f32.mrb[15].mxu0 }
 0x1bb   :  { %v1201_v8 = vpop.f32.mrb[16].mxu0 }
 0x1bc   :  { %v839_v9 = vsub.f32 %v1175_v55, %v1201_v8  ;;  %v598_v10 = vpop.f32.mrb[17].mxu0 }
 0x1bd   :  { %v838_v11 = vsub.f32 %v291_v56, %v598_v10  ;;  %v1560_v10 = vadd.s32 48, %v1389_v59 }
 0x1bf   :  { %v1204_v12 = vpop.f32.mrb[18].mxu0  ;;  %vm912_vm10 = vcmp.eq.s32.totalorder %v1560_v10, %v1538_v41 }
 0x1c0   :  { %v841_v13 = vsub.f32 %v1458_v57, %v1204_v12  ;;  %v608_v14 = vpop.f32.mrb[19].mxu0  ;;  %v1557_v57 = vadd.s32 56, %v1389_v59 }
 0x1c1   :  { %v840_v15 = vsub.f32 %v1460_v58, %v608_v14 }
 0x1c2   :  { %vm913_vm11 = vcmp.eq.s32.totalorder %v1557_v57, %v1538_v41 }
 0x1c3   :  { %v1488_v16 = vpop.f32.mrb[20].mxu0 }
 0x1c4   :  { %v843_v17 = vsub.f32 %v1462_v60, %v1488_v16  ;;  %v1492_v18 = vpop.f32.mrb[21].mxu0  ;;  %v1586_v60 = vadd.s32 88, %v1389_v59 }
 0x1c5   :  { %v842_v19 = vsub.f32 %v1464_v61, %v1492_v18 }
 0x1c6   :  { %vm917_vm15 = vcmp.eq.s32.totalorder %v1586_v60, %v1538_v41 }
 0x1ca   :  { %v1496_v20 = vpop.f32.mrb[0].mxu1 }
 0x1cb   :  { %v845_v21 = vsub.f32 %v1466_v62, %v1496_v20  ;;  %v1500_v22 = vpop.f32.mrb[1].mxu1 }
 0x1cc   :  { %v844_v23 = vsub.f32 %v1468_v63, %v1500_v22  ;;  %v1607_v22 = vadd.s32 104, %v1389_v59 }
 0x1ce   :  { %vm919_vm1 = vcmp.eq.s32.totalorder %v1607_v22, %v1538_v41 }
 0x1d2   :  { %v1504_v24 = vpop.f32.mrb[2].mxu1 }
 0x1d3   :  { %v847_v25 = vsub.f32 %v1470_v0, %v1504_v24  ;;  %v1508_v26 = vpop.f32.mrb[3].mxu1 }
 0x1d4   :  { %v846_v27 = vsub.f32 %v1472_v1, %v1508_v26  ;;  %v897_v1 = vadd.s32 96, %v1389_v59 }
 0x1d6   :  { %vm918_vm0 = vcmp.eq.s32.totalorder %v897_v1, %v1538_v41 }
 0x1da   :  { %v1512_v28 = vpop.f32.mrb[4].mxu1 }
 0x1db   :  { %v849_v29 = vsub.f32 %v1474_v2, %v1512_v28  ;;  %v1516_v30 = vpop.f32.mrb[5].mxu1 }
 0x1dc   :  { %v848_v31 = vsub.f32 %v1476_v3, %v1516_v30 }
 0x1e2   :  { %v1520_v32 = vpop.f32.mrb[6].mxu1 }
 0x1e3   :  { %v851_v33 = vsub.f32 %v1478_v4, %v1520_v32  ;;  %v1524_v34 = vpop.f32.mrb[7].mxu1 }
 0x1e4   :  { %v850_v35 = vsub.f32 %v1480_v5, %v1524_v34 }
 0x1ea   :  { %v1528_v36 = vpop.f32.mrb[8].mxu1 }
 0x1eb   :  { %v853_v37 = vsub.f32 %v1482_v6, %v1528_v36  ;;  %v1532_v38 = vpop.f32.mrb[9].mxu1 }
 0x1ec   :  { %v852_v39 = vsub.f32 %v1484_v7, %v1532_v38 }
 0x1ee   :  { %v1227_v42 = vpop.f32.mrb[10].mxu1 }
 0x1ef   :  { %v855_v44 = vmul.f32 %v1227_v42, %v839_v9  ;;  %v743_v45 = vpop.f32.mrb[11].mxu1 }
 0x1f0   :  { %v854_v47 = vmul.f32 %v838_v11, %v743_v45 }
 0x1f1   :  { %v871_v48 = vmul.f32 0.03125, %v855_v44 }
 0x1f2   :  { %v870_v50 = vmul.f32 0.03125, %v854_v47  ;;  %v1230_v54 = vpop.f32.mrb[12].mxu1 }
 0x1f3   :  { %v1096_v52 = vadd.f32 -1.0, %v871_v48  ;;  %v955_v53 = vmul.f32 %v871_v48, %v871_v48  ;;  %v857_v55 = vmul.f32 %v1230_v54, %v841_v13  ;;  %v753_v56 = vpop.f32.mrb[13].mxu1  ;;  %v1565_v13 = vadd.s32 72, %v1389_v59 }
 0x1f4   :  { %v1095_v58 = vadd.f32 -1.0, %v870_v50  ;;  %v954_v8 = vmul.f32 %v870_v50, %v870_v50  ;;  %v856_v9 = vmul.f32 %v840_v15, %v753_v56  ;;  %v1570_v15 = vadd.s32 64, %v1389_v59 }
 0x1f5   :  { %v939_v11 = vmul.f32 %v1096_v52, %v1096_v52  ;;  %v971_v12 = vmul.f32 0.005, %v955_v53  ;;  %v873_v14 = vmul.f32 0.03125, %v857_v55  ;;  %vm915_vm13 = vcmp.eq.s32.totalorder %v1565_v13, %v1538_v41 }
 0x1f6   :  { %v938_v42 = vmul.f32 %v1095_v58, %v1095_v58  ;;  %v970_v44 = vmul.f32 0.005, %v954_v8  ;;  %v872_v45 = vmul.f32 0.03125, %v856_v9  ;;  %v1233_v47 = vpop.f32.mrb[14].mxu1  ;;  %vm914_vm12 = vcmp.eq.s32.totalorder %v1570_v15, %v1538_v41 }
 0x1f7   :  { %v987_v48 = vsel %vm907_vm4, %v939_v11, %v971_v12  ;;  %v1098_v50 = vadd.f32 -1.0, %v873_v14  ;;  %v957_v54 = vmul.f32 %v873_v14, %v873_v14  ;;  %v859_v52 = vmul.f32 %v1233_v47, %v843_v17  ;;  %v763_v53 = vpop.f32.mrb[15].mxu1 }
 0x1f8   :  { %v986_v55 = vsel %vm906_vm5, %v938_v42, %v970_v44  ;;  %v1097_v56 = vadd.f32 -1.0, %v872_v45  ;;  %v956_v58 = vmul.f32 %v872_v45, %v872_v45  ;;  %v858_v8 = vmul.f32 %v842_v19, %v763_v53 }
 0x1f9   :  { %v1002_v9 = vadd.f32 %v987_v48, %v986_v55  ;;  %v941_v40 = vmul.f32 %v1098_v50, %v1098_v50  ;;  %v875_v11 = vmul.f32 0.03125, %v859_v52  ;;  %v973_v16 = vmul.f32 0.005, %v957_v54 }
 0x1fa   :  { %v940_v17 = vmul.f32 %v1097_v56, %v1097_v56  ;;  %v972_v12 = vmul.f32 0.005, %v956_v58  ;;  %v874_v14 = vmul.f32 0.03125, %v858_v8  ;;  %v1236_v42 = vpop.f32.mrb[16].mxu1  ;;  %v1594_v19 = vadd.s32 80, %v1389_v59 }
 0x1fb   :  { %v1100_v44 = vadd.f32 -1.0, %v875_v11  ;;  %v959_v45 = vmul.f32 %v875_v11, %v875_v11  ;;  %v861_v61 = vmul.f32 %v1236_v42, %v845_v21  ;;  %v773_v18 = vpop.f32.mrb[17].mxu1  ;;  %v989_v21 = vsel %vm909_vm7, %v941_v40, %v973_v16 }
 0x1fc   :  { %v988_v47 = vsel %vm908_vm6, %v940_v17, %v972_v12  ;;  %v1099_v48 = vadd.f32 -1.0, %v874_v14  ;;  %v958_v50 = vmul.f32 %v874_v14, %v874_v14  ;;  %v860_v54 = vmul.f32 %v844_v23, %v773_v18 }
 0x1fd   :  { %v1003_v52 = vadd.f32 %v1002_v9, %v988_v47  ;;  %v943_v53 = vmul.f32 %v1100_v44, %v1100_v44  ;;  %v975_v62 = vmul.f32 0.005, %v959_v45  ;;  %v877_v20 = vmul.f32 0.03125, %v861_v61 }
 0x1fe   :  { %v942_v55 = vmul.f32 %v1099_v48, %v1099_v48  ;;  %v974_v56 = vmul.f32 0.005, %v958_v50  ;;  %v876_v58 = vmul.f32 0.03125, %v860_v54  ;;  %v1239_v8 = vpop.f32.mrb[18].mxu1  ;;  %vm916_vm14 = vcmp.eq.s32.totalorder %v1594_v19, %v1538_v41 }
 0x1ff   :  { %v1004_v43 = vadd.f32 %v1003_v52, %v989_v21  ;;  %v1102_v11 = vadd.f32 -1.0, %v877_v20  ;;  %v961_v17 = vmul.f32 %v877_v20, %v877_v20  ;;  %v783_v63 = vpop.f32.mrb[19].mxu1  ;;  %v863_v40 = vmul.f32 %v1239_v8, %v847_v25 }
 0x200   :  { %v990_v23 = vsel %vm910_vm8, %v942_v55, %v974_v56  ;;  %v1101_v46 = vadd.f32 -1.0, %v876_v58  ;;  %v960_v9 = vmul.f32 %v876_v58, %v876_v58  ;;  %v991_v16 = vsel %vm911_vm9, %v943_v53, %v975_v62 }
 0x201   :  { %v1005_v12 = vadd.f32 %v1004_v43, %v990_v23  ;;  %v945_v14 = vmul.f32 %v1102_v11, %v1102_v11  ;;  %v862_v49 = vmul.f32 %v846_v27, %v783_v63  ;;  %v977_v42 = vmul.f32 0.005, %v961_v17 }
 0x202   :  { %v944_v44 = vmul.f32 %v1101_v46, %v1101_v46  ;;  %v976_v0 = vmul.f32 0.005, %v960_v9  ;;  %v879_v24 = vmul.f32 0.03125, %v863_v40  ;;  %v1242_v25 = vpop.f32.mrb[20].mxu1  ;;  %vm1027_vm4 = vcmask 0  }
 0x203   :  { %v1006_v45 = vadd.f32 %v1005_v12, %v991_v16  ;;  %v878_v61 = vmul.f32 0.03125, %v862_v49  ;;  %v865_v51 = vmul.f32 %v1242_v25, %v849_v29  ;;  %v793_v18 = vpop.f32.mrb[21].mxu1  ;;  %v993_v29 = vsel %vm913_vm11, %v945_v14, %v977_v42 }
 0x204   :  { %v992_v26 = vsel %vm912_vm10, %v944_v44, %v976_v0  ;;  %v1104_v27 = vadd.f32 -1.0, %v879_v24  ;;  %v963_v47 = vmul.f32 %v879_v24, %v879_v24  ;;  %v864_v48 = vmul.f32 %v848_v31, %v793_v18 }
 0x205   :  { %v1007_v50 = vadd.f32 %v1006_v45, %v992_v26  ;;  %v1103_v54 = vadd.f32 -1.0, %v878_v61  ;;  %v962_v2 = vmul.f32 %v878_v61, %v878_v61  ;;  %v881_v28 = vmul.f32 0.03125, %v865_v51 }
 0x206   :  { %v947_v52 = vmul.f32 %v1104_v27, %v1104_v27  ;;  %v979_v53 = vmul.f32 0.005, %v963_v47  ;;  %v880_v62 = vmul.f32 0.03125, %v864_v48  ;;  %v1245_v20 = vpop.f32.mrb[22].mxu1  ;;  %v900_v61 = vadd.s32 120, %v1389_v59 }
 0x207   :  { %v946_v10 = vmul.f32 %v1103_v54, %v1103_v54  ;;  %v978_v21 = vmul.f32 0.005, %v962_v2  ;;  %v1008_v55 = vadd.f32 %v1007_v50, %v993_v29  ;;  %v1106_v56 = vadd.f32 -1.0, %v881_v28  ;;  %v803_v58 = vpop.f32.mrb[23].mxu1 }
 0x208   :  { %v965_v8 = vmul.f32 %v881_v28, %v881_v28  ;;  %v1105_v3 = vadd.f32 -1.0, %v880_v62  ;;  %v964_v30 = vmul.f32 %v880_v62, %v880_v62  ;;  %v867_v43 = vmul.f32 %v1245_v20, %v851_v33 }
 0x209   :  { %v994_v31 = vsel %vm914_vm12, %v946_v10, %v978_v21  ;;  %v949_v57 = vmul.f32 %v1106_v56, %v1106_v56  ;;  %v866_v11 = vmul.f32 %v850_v35, %v803_v58  ;;  %v995_v15 = vsel %vm915_vm13, %v947_v52, %v979_v53 }
 0x20a   :  { %v1009_v17 = vadd.f32 %v1008_v55, %v994_v31  ;;  %v981_v63 = vmul.f32 0.005, %v965_v8  ;;  %v948_v23 = vmul.f32 %v1105_v3, %v1105_v3  ;;  %v980_v46 = vmul.f32 0.005, %v964_v30  ;;  %v1248_v9 = vpop.f32.mrb[24].mxu1 }
 0x20b   :  { %v883_v40 = vmul.f32 0.03125, %v867_v43  ;;  %v882_v16 = vmul.f32 0.03125, %v866_v11  ;;  %v869_v4 = vmul.f32 %v1248_v9, %v853_v37  ;;  %v813_v5 = vpop.f32.mrb[25].mxu1  ;;  %v899_v35 = vadd.s32 112, %v1389_v59 }
 0x20c   :  { %v996_v32 = vsel %vm916_vm14, %v948_v23, %v980_v46  ;;  %v1010_v33 = vadd.f32 %v1009_v17, %v995_v15  ;;  %v868_v34 = vmul.f32 %v852_v39, %v813_v5  ;;  %v997_v6 = vsel %vm917_vm15, %v949_v57, %v981_v63 }
 0x20d   :  { %v1108_v13 = vadd.f32 -1.0, %v883_v40  ;;  %v967_v12 = vmul.f32 %v883_v40, %v883_v40  ;;  %v1107_v14 = vadd.f32 -1.0, %v882_v16  ;;  %v966_v49 = vmul.f32 %v882_v16, %v882_v16 }
 0x20e   :  { %v1011_v36 = vadd.f32 %v1010_v33, %v996_v32  ;;  %v885_v37 = vmul.f32 0.03125, %v869_v4  ;;  %v884_v42 = vmul.f32 0.03125, %v868_v34  ;;  %vm920_vm2 = vcmp.eq.s32.totalorder %v899_v35, %v1538_v41 }
 0x20f   :  { %v951_v19 = vmul.f32 %v1108_v13, %v1108_v13  ;;  %v983_v44 = vmul.f32 0.005, %v967_v12  ;;  %v950_v0 = vmul.f32 %v1107_v14, %v1107_v14  ;;  %v982_v24 = vmul.f32 0.005, %v966_v49 }
 0x210   :  { %v1110_v25 = vadd.f32 -1.0, %v885_v37  ;;  %v969_v7 = vmul.f32 %v885_v37, %v885_v37  ;;  %v1109_v38 = vadd.f32 -1.0, %v884_v42  ;;  %v968_v39 = vmul.f32 %v884_v42, %v884_v42 }
 0x211   :  { %v998_v45 = vsel %vm918_vm0, %v950_v0, %v982_v24  ;;  %v1012_v60 = vadd.f32 %v1011_v36, %v997_v6  ;;  %v999_v48 = vsel %vm919_vm1, %v951_v19, %v983_v44  ;;  %vm921_vm3 = vcmp.eq.s32.totalorder %v900_v61, %v1538_v41 }
 0x212   :  { %v952_v51 = vmul.f32 %v1109_v38, %v1109_v38  ;;  %v984_v18 = vmul.f32 0.005, %v968_v39  ;;  %v953_v27 = vmul.f32 %v1110_v25, %v1110_v25  ;;  %v985_v47 = vmul.f32 0.005, %v969_v7 }
 0x213   :  { %v1013_v26 = vadd.f32 %v1012_v60, %v998_v45 }
 0x214   :  { %v1000_v50 = vsel %vm920_vm2, %v952_v51, %v984_v18  ;;  %v1001_v2 = vsel %vm921_vm3, %v953_v27, %v985_v47 }
 0x215   :  { %v1014_v54 = vadd.f32 %v1013_v26, %v999_v48 }
 0x217   :  { %v1015_v1 = vadd.f32 %v1014_v54, %v1000_v50 }
 0x219   :  { %v1016_v28 = vadd.f32 %v1015_v1, %v1001_v2 }
 0x21b   :  { %1017 = vadd.xlane.f32.xlu1 %v1016_v28 }
 0x2a8   :  { %v1018_v59 = vpop.xlane.xlu1 %1017 }
 0x2a9   :  { %v1019_v29 = vrot.slane %v1018_v59, 4 }
 0x2ab   :  { %v1020_v52 = vadd.f32 %v1019_v29, %v1018_v59 }
 0x2ad   :  { %v1021_v53 = vrot.slane %v1020_v52, 2 }
 0x2af   :  { %v1022_v62 = vadd.f32 %v1021_v53, %v1020_v52 }
 0x2b1   :  { %v1023_v20 = vrot.slane %v1022_v62, 1 }
 0x2b3   :  { %v1024_v10 = vadd.f32 %v1023_v20, %v1022_v62 }
 0x2b5   :  { %1259 = vpush %v1024_v10 }
 0x2e6   :  { %s1260_s7 = spop %1259 }
 0x2e7   :  { %v1026_v22 = vstv %s1260_s7 }
 0x2e8   :  { %1028 = vst.msk [vmem:[#allocation12] sm:$0x1] %vm1027_vm4, %v1026_v22 }
 0x2e9   :  { %1326 = shalt.err (!%p1323_p6)
}
 0x2ea   :  { %s1327_s12 = scalar_lea.hbm %s1690_s2, 16 }
 0x2eb   :  { %p1328_p7 = scmp.ne.s32.totalorder %s1690_s2, %s1327_s12  ;;  %p1331_p8 = scmp.lt.u32.totalorder %s1327_s12, %s1690_s2 }
 0x2ed   :  { %p1333_p9 = pnand %p1331_p8, %p1328_p7 }
 0x2ef   :  { %1336 = shalt.err (!%p1333_p9)
}
 0x2f0   :  { %1038 = dma.vmem_to_hbm [thread:$0]  %s1036_s6, 16, %s1690_s2, [#allocation9]  }
 0x2f1   :  { %1341 = dma.done.wait [#allocation9], 16  }
 0x2f2   :  { %1342 = vsyncadd [#allocation9], 4294967280 }
 0x2f3   :  { %1042 = vsyncpa [#allocation8], 1 }
 0x2f4   :  { %1043 = vsyncpa [#allocation11], 1 }
 0x2f5   :  { %1044 = vsyncpa [#allocation9], 1 }

</bundles_post_ra>
